<compile_context>
chip_gen: v5e
topology: v5e:2x2
jax: 0.10.0
libtpu: 0.0.40
codegen_flags: <defaults>
</compile_context>

<pallas_src>
import math

import jax
import jax.numpy as jnp
from jax.experimental import pallas as pl
from jax.experimental.pallas import tpu as pltpu


def _kv_attn_kernel(len_ref,            # (Bt, 1)  int32 valid lengths
                    dec_ref,            # (Bt, D)  compute dtype
                    enc_ref,            # (Bt, T, E) compute dtype (dominant HBM stream)
                    wq_ref, bq_ref,     # (D, A) cdt, (1, A) f32
                    wk_ref,             # (E, A) cdt
                    wv_ref, bv_ref,     # (E, O) cdt, (1, O) f32
                    out_ref,            # (Bt, O) f32
                    attn_ref):          # (Bt, T) f32
    f32 = jnp.float32
    bt, t, e = enc_ref.shape
    a = wq_ref.shape[1]
    cdt = enc_ref.dtype
    inv_scale = 1.0 / math.sqrt(float(a))   # fold 1/sqrt(A) into q (one (Bt, A) multiply)

    # ---- query path (small matmuls, M = Bt) --------------------------------
    # q = (dec @ Wq + bq) / sqrt(A).  The key bias bk is dropped: a per-row
    # constant added to the pre-softmax scores cancels inside the softmax.
    q = jnp.dot(dec_ref[...], wq_ref[...], preferred_element_type=f32)
    q = (q + bq_ref[...]) * inv_scale                                   # (Bt, A) f32
    # r = q @ Wk^T, contracting the attention dim directly (no explicit .T /
    # no XLU transpose).
    r = jax.lax.dot_general(
        q.astype(cdt), wk_ref[...],
        dimension_numbers=(((1,), (1,)), ((), ())),
        preferred_element_type=f32)                                     # (Bt, E)

    # ---- stream enc once: both scores and context contract against enc -----
    enc = enc_ref[...]                                                  # (Bt, T, E)
    # scores[b, t] = sum_e r[b, e] * enc[b, t, e]   (never materializes (T, A))
    scores = jnp.einsum('bqe,bte->bqt',
                        r.astype(cdt).reshape(bt, 1, e), enc,
                        preferred_element_type=f32).reshape(bt, t)      # (Bt, T) f32

    # Length mask: positions >= enc_len get a large finite negative (keeps
    # fully-masked rows NaN-free; exp underflows to exactly 0 otherwise).
    pos = jax.lax.broadcasted_iota(jnp.int32, (bt, t), 1)
    scores = jnp.where(pos < len_ref[...], scores, jnp.float32(-1e30))

    # Numerically-stable softmax over time (f32).
    m = jnp.max(scores, axis=-1, keepdims=True)
    p = jnp.exp(scores - m)
    denom = jnp.sum(p, axis=-1, keepdims=True)
    attn = p * pl.reciprocal(denom, approx=False)                       # (Bt, T) f32
    attn_ref[...] = attn

    # ctx[b, e] = sum_t attn[b, t] * enc[b, t, e]   (never materializes (T, O))
    ctx = jnp.einsum('bqt,bte->bqe',
                     attn.astype(cdt).reshape(bt, 1, t), enc,
                     preferred_element_type=f32).reshape(bt, e)         # (Bt, E)

    # out = ctx @ Wv + bv  (bv moved past the context matmul: attn rows sum to 1)
    out_ref[...] = jnp.dot(ctx.astype(cdt), wv_ref[...],
                           preferred_element_type=f32) + bv_ref[...]


def key_value_attention(enc_states, enc_len, dec_states, params,
                        *, compute_dtype=jnp.float32, batch_tile=32):
    """Returns (out [B, output_dim], normalized_scores [B, 1, T])."""
    B, T, E = enc_states.shape
    D = dec_states.shape[-1]
    A = params["wq"].shape[1]
    O = params["wv"].shape[1]

    cdt = compute_dtype
    enc = enc_states.astype(cdt)
    dec = dec_states.astype(cdt)
    wq = params["wq"].astype(cdt)
    wk = params["wk"].astype(cdt)
    wv = params["wv"].astype(cdt)
    bq = params["bq"].astype(jnp.float32)
    bv = params["bv"].astype(jnp.float32)
    # params["bk"] is intentionally unused: it cancels in the softmax.

    lens = enc_len.astype(jnp.int32).reshape(B, 1)

    # Batch tiling: B_TILE rows per grid step (query matmuls get M = B_TILE,
    # per-step pipeline overhead is amortized, output stores are slab-shaped).
    if B <= batch_tile:
        bt, Bp = B, B                               # blocks == full array dims
    else:
        bt = max(8, (batch_tile // 8) * 8)          # sublane-aligned tile
        Bp = pl.cdiv(B, bt) * bt
        pad = Bp - B
        enc = jnp.pad(enc, ((0, pad), (0, 0), (0, 0)))
        dec = jnp.pad(dec, ((0, pad), (0, 0)))
        lens = jnp.pad(lens, ((0, pad), (0, 0)))    # len 0 -> finite output, sliced off

    grid = (Bp // bt,)

    out, attn = pl.pallas_call(
        _kv_attn_kernel,
        grid=grid,
        in_specs=[
            pl.BlockSpec((bt, 1),    lambda i: (i, 0)),     # enc_len
            pl.BlockSpec((bt, D),    lambda i: (i, 0)),     # dec_states
            pl.BlockSpec((bt, T, E), lambda i: (i, 0, 0)),  # enc_states
            pl.BlockSpec((D, A),     lambda i: (0, 0)),     # Wq
            pl.BlockSpec((1, A),     lambda i: (0, 0)),     # bq
            pl.BlockSpec((E, A),     lambda i: (0, 0)),     # Wk
            pl.BlockSpec((E, O),     lambda i: (0, 0)),     # Wv
            pl.BlockSpec((1, O),     lambda i: (0, 0)),     # bv
        ],
        out_specs=[
            pl.BlockSpec((bt, O), lambda i: (i, 0)),        # context vectors
            pl.BlockSpec((bt, T), lambda i: (i, 0)),        # attention (lane-dense slab)
        ],
        out_shape=(
            jax.ShapeDtypeStruct((Bp, O), jnp.float32),
            jax.ShapeDtypeStruct((Bp, T), jnp.float32),
        ),
        compiler_params=pltpu.CompilerParams(
            # Batch tiles are independent -> shard grid steps across TCs (v7x).
            dimension_semantics=("parallel",),
        ),
        # TODO(synk): for very long T on v7x (64 MiB VMEM), add a T grid axis with an
        # online-softmax accumulator and single-buffer the weight specs.
    )(lens, dec, enc, wq, bq, wk, wv, bv)

    out = out[:B]
    attn = attn[:B].reshape(B, 1, T)
    return out, attn


def init_params(key, enc_dim, dec_dim, attn_dim, output_dim):
    """Deterministic Linear-style init; weights stored (in, out)."""
    ks = jax.random.split(key, 8)

    def lin(kw, kb, fan_in, fan_out):
        bound = 1.0 / math.sqrt(fan_in)
        w = jax.random.uniform(kw, (fan_in, fan_out), jnp.float32, -bound, bound)
        b = jax.random.uniform(kb, (1, fan_out), jnp.float32, -bound, bound)
        return w, b

    wk, bk = lin(ks[0], ks[1], enc_dim, attn_dim)
    wq, bq = lin(ks[2], ks[3], dec_dim, attn_dim)
    wv, bv = lin(ks[4], ks[5], enc_dim, output_dim)
    return dict(wk=wk, bk=bk, wq=wq, bq=bq, wv=wv, bv=bv)


def _reference(enc_states, enc_len, dec_states, params):
    """Plain-JAX reference mirroring the PyTorch forward exactly."""
    keys = enc_states @ params["wk"] + params["bk"]                 # (B, T, A)
    vals = enc_states @ params["wv"] + params["bv"]                 # (B, T, O)
    q = (dec_states @ params["wq"] + params["bq"])[:, :, None]      # (B, A, 1)
    A = params["wk"].shape[1]
    scores = jnp.matmul(keys, q) / math.sqrt(float(A))              # (B, T, 1)
    T = enc_states.shape[1]
    mask = (jnp.arange(T)[None, :] < enc_len[:, None])[:, :, None]  # (B, T, 1)
    scores = jnp.where(mask, scores, -jnp.inf)
    nscores = jax.nn.softmax(scores, axis=1).transpose(0, 2, 1)     # (B, 1, T)
    out = jnp.matmul(nscores, vals)[:, 0, :]                        # (B, O)
    return out, nscores


if __name__ == "__main__":
    B, T = 4, 16
    enc_dim, dec_dim, attn_dim, output_dim = 32, 24, 32, 16

    key = jax.random.PRNGKey(0)
    k_enc, k_dec, k_par = jax.random.split(key, 3)

    enc_states = jax.random.normal(k_enc, (B, T, enc_dim), jnp.float32)
    dec_states = jax.random.normal(k_dec, (B, dec_dim), jnp.float32)
    enc_len = jnp.array([T, 9, 5, T], dtype=jnp.int32)

    params = init_params(k_par, enc_dim, dec_dim, attn_dim, output_dim)
    out_ref, attn_ref = _reference(enc_states, enc_len, dec_states, params)

    # float32 operands: matches the reference tightly.
    out, attn = key_value_attention(enc_states, enc_len, dec_states, params)
    out = jax.block_until_ready(out)
    attn = jax.block_until_ready(attn)
    assert out.shape == (B, output_dim) and attn.shape == (B, 1, T)
    assert jnp.allclose(out, out_ref, atol=1e-4, rtol=1e-4)
    assert jnp.allclose(attn, attn_ref, atol=1e-4, rtol=1e-4)
    assert float(jnp.abs(attn[1, 0, 9:]).max()) == 0.0   # masked positions exactly zero

    # bfloat16 operands (MXU-native on v6e/v7x, halves the enc HBM stream);
    # softmax / masking / accumulation stay f32 inside the kernel.
    out_bf, attn_bf = key_value_attention(enc_states, enc_len, dec_states, params,
                                          compute_dtype=jnp.bfloat16)
    out_bf = jax.block_until_ready(out_bf)
    attn_bf = jax.block_until_ready(attn_bf)
    assert jnp.allclose(out_bf, out_ref, atol=5e-2, rtol=5e-2)
    assert jnp.allclose(attn_bf, attn_ref, atol=5e-2, rtol=5e-2)

    print("KERNEL_OK")
</pallas_src>

<mosaic_0001>
module attributes {stable_mosaic.version = 11 : i64} {
  func.func @_kv_attn_kernel(%arg0: i32, %arg1: memref<4x1xi32, #tpu.memory_space<vmem>>, %arg2: memref<4x24xf32, #tpu.memory_space<vmem>>, %arg3: memref<4x16x32xf32, #tpu.memory_space<vmem>>, %arg4: memref<24x32xf32, #tpu.memory_space<vmem>>, %arg5: memref<1x32xf32, #tpu.memory_space<vmem>>, %arg6: memref<32x32xf32, #tpu.memory_space<vmem>>, %arg7: memref<32x16xf32, #tpu.memory_space<vmem>>, %arg8: memref<1x16xf32, #tpu.memory_space<vmem>>, %arg9: memref<4x16xf32, #tpu.memory_space<vmem>>, %arg10: memref<4x16xf32, #tpu.memory_space<vmem>>) attributes {dimension_semantics = [#tpu.dimension_semantics<parallel>], iteration_bounds = array<i64: 1>, scalar_prefetch = 0 : i64, scratch_operands = 0 : i64, tpu.core_type = #tpu.core_type<tc>, window_params = [{transform_indices = @transform_0, window_bounds = array<i64: 4, 1>}, {transform_indices = @transform_1, window_bounds = array<i64: 4, 24>}, {transform_indices = @transform_2, window_bounds = array<i64: 4, 16, 32>}, {pipeline_mode = #tpu.pipeline_mode<synchronous>, transform_indices = @transform_3, window_bounds = array<i64: 24, 32>}, {pipeline_mode = #tpu.pipeline_mode<synchronous>, transform_indices = @transform_4, window_bounds = array<i64: 1, 32>}, {pipeline_mode = #tpu.pipeline_mode<synchronous>, transform_indices = @transform_5, window_bounds = array<i64: 32, 32>}, {pipeline_mode = #tpu.pipeline_mode<synchronous>, transform_indices = @transform_6, window_bounds = array<i64: 32, 16>}, {pipeline_mode = #tpu.pipeline_mode<synchronous>, transform_indices = @transform_7, window_bounds = array<i64: 1, 16>}, {transform_indices = @transform_8, window_bounds = array<i64: 4, 16>}, {transform_indices = @transform_9, window_bounds = array<i64: 4, 16>}]} {
    %c0 = arith.constant 0 : index
    %c0_0 = arith.constant 0 : index
    %0 = vector.load %arg2[%c0, %c0_0] : memref<4x24xf32, #tpu.memory_space<vmem>>, vector<4x24xf32>
    %c0_1 = arith.constant 0 : index
    %c0_2 = arith.constant 0 : index
    %1 = vector.load %arg4[%c0_1, %c0_2] : memref<24x32xf32, #tpu.memory_space<vmem>>, vector<24x32xf32>
    %cst = arith.constant dense<0.000000e+00> : vector<4x32xf32>
    %2 = tpu.matmul %0, %1, %cst {dimension_numbers = #tpu.dot_dimension_numbers<[1], [0], [0], [1], [0, 0, 1, 1], [], []>} : vector<4x24xf32>, vector<24x32xf32>, vector<4x32xf32> -> vector<4x32xf32>
    %c0_3 = arith.constant 0 : index
    %c0_4 = arith.constant 0 : index
    %3 = vector.load %arg5[%c0_3, %c0_4] : memref<1x32xf32, #tpu.memory_space<vmem>>, vector<1x32xf32>
    %4 = vector.broadcast %3 : vector<1x32xf32> to vector<4x32xf32>
    %5 = arith.addf %2, %4 : vector<4x32xf32>
    %cst_5 = arith.constant 0.176776692 : f32
    %6 = vector.broadcast %cst_5 : f32 to vector<4x32xf32>
    %7 = arith.mulf %5, %6 : vector<4x32xf32>
    %c0_6 = arith.constant 0 : index
    %c0_7 = arith.constant 0 : index
    %8 = vector.load %arg6[%c0_6, %c0_7] : memref<32x32xf32, #tpu.memory_space<vmem>>, vector<32x32xf32>
    %cst_8 = arith.constant dense<0.000000e+00> : vector<4x32xf32>
    %9 = tpu.matmul %7, %8, %cst_8 {dimension_numbers = #tpu.dot_dimension_numbers<[1], [1], [0], [0], [0, 0, 1, 0], [], []>} : vector<4x32xf32>, vector<32x32xf32>, vector<4x32xf32> -> vector<4x32xf32>
    %c0_9 = arith.constant 0 : index
    %c0_10 = arith.constant 0 : index
    %c0_11 = arith.constant 0 : index
    %10 = vector.load %arg3[%c0_9, %c0_10, %c0_11] : memref<4x16x32xf32, #tpu.memory_space<vmem>>, vector<4x16x32xf32>
    %11 = vector.shape_cast %9 : vector<4x32xf32> to vector<4x1x32xf32>
    "tpu.trace_start"() <{level = 10 : i32, message = "bqe,bte->bqt"}> : () -> ()
    %cst_12 = arith.constant dense<0.000000e+00> : vector<4x1x16xf32>
    %12 = tpu.matmul %11, %10, %cst_12 {dimension_numbers = #tpu.dot_dimension_numbers<[2], [2], [1], [1], [0, 0, 0, 1, 1, 1], [0], [0]>} : vector<4x1x32xf32>, vector<4x16x32xf32>, vector<4x1x16xf32> -> vector<4x1x16xf32>
    "tpu.trace_stop"() : () -> ()
    %13 = vector.shape_cast %12 : vector<4x1x16xf32> to vector<4x16xf32>
    %14 = tpu.iota {dimensions = array<i32: 1>} : vector<4x16xi32>
    %c0_13 = arith.constant 0 : index
    %c0_14 = arith.constant 0 : index
    %15 = vector.load %arg1[%c0_13, %c0_14] : memref<4x1xi32, #tpu.memory_space<vmem>>, vector<4x1xi32>
    %16 = vector.broadcast %15 : vector<4x1xi32> to vector<4x16xi32>
    %17 = arith.cmpi slt, %14, %16 : vector<4x16xi32>
    %cst_15 = arith.constant -1.000000e+30 : f32
    %18 = vector.broadcast %cst_15 : f32 to vector<4x16xf32>
    %19 = arith.select %17, %13, %18 : vector<4x16xi1>, vector<4x16xf32>
    %cst_16 = arith.constant dense<0xFF800000> : vector<4xf32>
    %20 = vector.multi_reduction <maximumf>, %19, %cst_16 [1] : vector<4x16xf32> to vector<4xf32>
    %21 = vector.shape_cast %20 : vector<4xf32> to vector<4x1xf32>
    %22 = vector.broadcast %21 : vector<4x1xf32> to vector<4x16xf32>
    %23 = arith.subf %19, %22 : vector<4x16xf32>
    %24 = math.exp %23 : vector<4x16xf32>
    %cst_17 = arith.constant dense<0.000000e+00> : vector<4xf32>
    %25 = vector.multi_reduction <add>, %24, %cst_17 [1] : vector<4x16xf32> to vector<4xf32>
    %26 = vector.shape_cast %25 : vector<4xf32> to vector<4x1xf32>
    %27 = tpu.reciprocal %26 : vector<4x1xf32> -> vector<4x1xf32>
    %28 = vector.broadcast %27 : vector<4x1xf32> to vector<4x16xf32>
    %29 = arith.mulf %24, %28 : vector<4x16xf32>
    %c0_18 = arith.constant 0 : index
    %c0_19 = arith.constant 0 : index
    %30 = vector.load %arg10[%c0_18, %c0_19] : memref<4x16xf32, #tpu.memory_space<vmem>>, vector<4x16xf32>
    tpu.vector_store %arg10[%c0_18, %c0_19], %29 {strides = array<i32>} : memref<4x16xf32, #tpu.memory_space<vmem>>, vector<4x16xf32>,
    %31 = vector.shape_cast %29 : vector<4x16xf32> to vector<4x1x16xf32>
    "tpu.trace_start"() <{level = 10 : i32, message = "bqt,bte->bqe"}> : () -> ()
    %cst_20 = arith.constant dense<0.000000e+00> : vector<4x1x32xf32>
    %32 = tpu.matmul %31, %10, %cst_20 {dimension_numbers = #tpu.dot_dimension_numbers<[2], [1], [1], [2], [0, 0, 0, 1, 1, 2], [0], [0]>} : vector<4x1x16xf32>, vector<4x16x32xf32>, vector<4x1x32xf32> -> vector<4x1x32xf32>
    "tpu.trace_stop"() : () -> ()
    %33 = vector.shape_cast %32 : vector<4x1x32xf32> to vector<4x32xf32>
    %c0_21 = arith.constant 0 : index
    %c0_22 = arith.constant 0 : index
    %34 = vector.load %arg7[%c0_21, %c0_22] : memref<32x16xf32, #tpu.memory_space<vmem>>, vector<32x16xf32>
    %cst_23 = arith.constant dense<0.000000e+00> : vector<4x16xf32>
    %35 = tpu.matmul %33, %34, %cst_23 {dimension_numbers = #tpu.dot_dimension_numbers<[1], [0], [0], [1], [0, 0, 1, 1], [], []>} : vector<4x32xf32>, vector<32x16xf32>, vector<4x16xf32> -> vector<4x16xf32>
    %c0_24 = arith.constant 0 : index
    %c0_25 = arith.constant 0 : index
    %36 = vector.load %arg8[%c0_24, %c0_25] : memref<1x16xf32, #tpu.memory_space<vmem>>, vector<1x16xf32>
    %37 = vector.broadcast %36 : vector<1x16xf32> to vector<4x16xf32>
    %38 = arith.addf %35, %37 : vector<4x16xf32>
    %c0_26 = arith.constant 0 : index
    %c0_27 = arith.constant 0 : index
    %39 = vector.load %arg9[%c0_26, %c0_27] : memref<4x16xf32, #tpu.memory_space<vmem>>, vector<4x16xf32>
    tpu.vector_store %arg9[%c0_26, %c0_27], %38 {strides = array<i32>} : memref<4x16xf32, #tpu.memory_space<vmem>>, vector<4x16xf32>,
    return
  }
  func.func @transform_0(%arg0: i32) -> (i32, i32) {
    %c0_i32 = arith.constant 0 : i32
    %c0_i32_0 = arith.constant 0 : i32
    return %arg0, %c0_i32 : i32, i32
  }
  func.func @transform_1(%arg0: i32) -> (i32, i32) {
    %c0_i32 = arith.constant 0 : i32
    %c0_i32_0 = arith.constant 0 : i32
    return %arg0, %c0_i32 : i32, i32
  }
  func.func @transform_2(%arg0: i32) -> (i32, i32, i32) {
    %c0_i32 = arith.constant 0 : i32
    %c0_i32_0 = arith.constant 0 : i32
    %c0_i32_1 = arith.constant 0 : i32
    return %arg0, %c0_i32, %c0_i32_0 : i32, i32, i32
  }
  func.func @transform_3(%arg0: i32) -> (i32, i32) {
    %c0_i32 = arith.constant 0 : i32
    %c0_i32_0 = arith.constant 0 : i32
    %c0_i32_1 = arith.constant 0 : i32
    return %c0_i32, %c0_i32_0 : i32, i32
  }
  func.func @transform_4(%arg0: i32) -> (i32, i32) {
    %c0_i32 = arith.constant 0 : i32
    %c0_i32_0 = arith.constant 0 : i32
    %c0_i32_1 = arith.constant 0 : i32
    return %c0_i32, %c0_i32_0 : i32, i32
  }
  func.func @transform_5(%arg0: i32) -> (i32, i32) {
    %c0_i32 = arith.constant 0 : i32
    %c0_i32_0 = arith.constant 0 : i32
    %c0_i32_1 = arith.constant 0 : i32
    return %c0_i32, %c0_i32_0 : i32, i32
  }
  func.func @transform_6(%arg0: i32) -> (i32, i32) {
    %c0_i32 = arith.constant 0 : i32
    %c0_i32_0 = arith.constant 0 : i32
    %c0_i32_1 = arith.constant 0 : i32
    return %c0_i32, %c0_i32_0 : i32, i32
  }
  func.func @transform_7(%arg0: i32) -> (i32, i32) {
    %c0_i32 = arith.constant 0 : i32
    %c0_i32_0 = arith.constant 0 : i32
    %c0_i32_1 = arith.constant 0 : i32
    return %c0_i32, %c0_i32_0 : i32, i32
  }
  func.func @transform_8(%arg0: i32) -> (i32, i32) {
    %c0_i32 = arith.constant 0 : i32
    %c0_i32_0 = arith.constant 0 : i32
    return %arg0, %c0_i32 : i32, i32
  }
  func.func @transform_9(%arg0: i32) -> (i32, i32) {
    %c0_i32 = arith.constant 0 : i32
    %c0_i32_0 = arith.constant 0 : i32
    return %arg0, %c0_i32 : i32, i32
  }
}

</mosaic_0001>

<bundles_post_ra>
// kernel: tpu_custom_call.1
= control target key start
LH: loop header
LB: loop body
LE: loop exit
PB: predicated region body
PF: predicated region fallthrough
CT: control target
= control target key end

     0   :  { %15 = vsyncpa [#allocation3], 0  ;;  %s756_s0 = inlined_call_operand.vmem [shape: s32[4,1], index: 0, kind: input, shape index: {}]   ;;  %s757_s1 = inlined_call_operand.hbm [shape: f32[4,24], index: 1, kind: input, shape index: {}]   ;;  %s758_s2 = inlined_call_operand.hbm [shape: f32[4,16,32], index: 2, kind: input, shape index: {}]   ;;  %s759_s3 = inlined_call_operand.vmem [shape: f32[24,32], index: 3, kind: input, shape index: {}]   ;;  %s760_s4 = inlined_call_operand.vmem [shape: f32[1,32], index: 4, kind: input, shape index: {}]   ;;  %s761_s5 = inlined_call_operand.vmem [shape: f32[32,32], index: 5, kind: input, shape index: {}]   ;;  %s762_s6 = inlined_call_operand.vmem [shape: f32[32,16], index: 6, kind: input, shape index: {}]   ;;  %s763_s7 = inlined_call_operand.vmem [shape: f32[1,16], index: 7, kind: input, shape index: {}]   ;;  %s764_s8 = inlined_call_operand.hbm [shape: f32[4,16], index: 8, kind: output, shape index: {0}]   ;;  %s765_s9 = inlined_call_operand.hbm [shape: f32[4,16], index: 9, kind: output, shape index: {1}]  }
   0x1   :  { %16 = vsyncpa [#allocation6], 0 }
   0x2   :  { %17 = vsyncpa [#allocation4], 0 }
   0x3   :  { %18 = vsyncpa [#allocation9], 0  ;;  %s26_s11 = sshll.u32 %s757_s1, 4  ;;  %s617_s12 = smov [#allocation2]   ;;  %s27_s11 = int_to_ptr.hbm [resolvable:$true] %s26_s11 }
   0x4   :  { %s28_s13 = sshll.u32 %s617_s12, 4  ;;  %s36_s16 = sshll.u32 %s758_s2, 4  ;;  %s29_s13 = int_to_ptr.vmem [resolvable:$true] %s28_s13  ;;  %s37_s16 = int_to_ptr.hbm [resolvable:$true] %s36_s16 }
   0x5   :  { %31 = dma.hbm_to_vmem [thread:$0]  %s27_s11, 64, %s29_s13, [#allocation3]  }
   0x6   :  { %s618_s17 = smov [#allocation5]   ;;  %s619_s19 = smov 128  }
   0x7   :  { %s38_s18 = sshll.u32 %s618_s17, 4  ;;  %s620_s20 = smov 8   ;;  %s39_s18 = int_to_ptr.vmem [resolvable:$true] %s38_s18 }
   0x8   :  { %44 = dma.hbm_to_vmem [thread:$0]  %s37_s16, 1024, %s39_s18, [#allocation6], %s619_s19, %s619_s19, %s620_s20  }
   0x9   :  { %609 = dma.done.wait [#allocation3], 64  }
   0xa   :  { %610 = vsyncadd [#allocation3], 4294967232 }
   0xb   :  { %611 = dma.done.wait [#allocation6], 1024  }
   0xc   :  { %612 = vsyncadd [#allocation6], 4294966272  ;;  %vm100_vm0 = vcmask 261120   ;;  %v66_v0 = vld [vmem:[%s759_s3 + $0x10] sm:$0xff]  ;;  %v65_v1 = vld [vmem:[%s759_s3 + $0x8] sm:$0xff]  ;;  %vm71_vm1 = vcmask 195584   ;;  %v260_v27 = vlaneseq }
   0xd   :  { %88 = vmatpush.msra.mxu0 %v66_v0  ;;  %v99_v2 = vld [vmem:[%s761_s5 + $0x18] sm:$0xff]  ;;  %v64_v3 = vld [vmem:[%s759_s3] sm:$0xff]  ;;  %v98_v5 = vld [vmem:[%s761_s5 + $0x10] sm:$0xff]  ;;  %v621_v21 = vmov 0   ;;  %vm272_vm2 = vcmask 1041409   ;;  %vm275_vm3 = vcmask 1042434  }
   0xe   :  { %477 = vmatpush.xpose.msk.msra.mxu1 %vm100_vm0, %v99_v2  ;;  %v63_v4 = vld [vmem:[#allocation2] sm:$0xf]  ;;  %v97_v6 = vld [vmem:[%s761_s5 + $0x8] sm:$0xff]  ;;  %v138_v16 = vld [vmem:[#allocation5 + $0x10] sm:$0xff]  ;;  %506 = vset.pattern.permute.xlu0 %v621_v21  ;;  %v261_v31 = vand.u32 127, %v260_v27  ;;  %vm278_vm4 = vcmask 1043459  }
   0xf   :  { %89 = vmatpush.msra.mxu0 %v65_v1  ;;  %v96_v7 = vld [vmem:[%s761_s5] sm:$0xff]  ;;  %v137_v8 = vld [vmem:[#allocation5 + $0x8] sm:$0xff]  ;;  %v142_v19 = vld [vmem:[#allocation5 + $0x30] sm:$0xff]  ;;  %vm282_vm6 = vcmask 125952   ;;  %vm312_vm11 = vcmask 130048   ;;  %s622_s20 = smov [#allocation8]  }
  0x10   :  { %v139_v9 = vld [vmem:[#allocation5 + $0x18] sm:$0xff]  ;;  %v141_v10 = vld [vmem:[#allocation5 + $0x28] sm:$0xff]  ;;  %482 = vmatpush.xpose.msk.msra.mxu2 %vm100_vm0, %v137_v8  ;;  %v136_v11 = vld [vmem:[#allocation5] sm:$0xff]  ;;  %s458_s1 = sshll.u32 %s622_s20, 4  ;;  %s460_s22 = sshll.u32 %s765_s9, 4  ;;  %s459_s1 = int_to_ptr.vmem [resolvable:$true] %s458_s1  ;;  %s461_s22 = int_to_ptr.hbm [resolvable:$true] %s460_s22 }
  0x11   :  { %90 = vmatpush.msra.mxu0 %v64_v3  ;;  %485 = vmatpush.xpose.msk.msra.mxu3 %vm100_vm0, %v139_v9  ;;  %v507_v12 = vld [vmem:[%s760_s4] ss:$0 sm:$0xff]  ;;  %v140_v17 = vld [vmem:[#allocation5 + $0x20] sm:$0xff]  ;;  %v404_v61 = vld [vmem:[%s762_s6 + $0x18] sm:$0xff]  ;;  %s623_s24 = smov [#allocation7]   ;;  %s449_s28 = sshll.u32 %s764_s8, 4  ;;  %s450_s28 = int_to_ptr.hbm [resolvable:$true] %s449_s28 }
  0x12   :  { %476 = vmatmul.msk.f32.vlgmr.msra.gmra.mxu0 %vm71_vm1, %v63_v4  ;;  %478 = vmatpush.xpose.msk.msra.mxu1 %vm100_vm0, %v98_v5  ;;  %v143_v18 = vld [vmem:[#allocation5 + $0x38] sm:$0xff]  ;;  %v403_v62 = vld [vmem:[%s762_s6 + $0x10] sm:$0xff]  ;;  %v402_v63 = vld [vmem:[%s762_s6 + $0x8] sm:$0xff]  ;;  %s447_s25 = sshll.u32 %s623_s24, 4  ;;  %s448_s25 = int_to_ptr.vmem [resolvable:$true] %s447_s25 }
  0x13   :  { %488 = vmatpush.xpose.msk.msrb.mxu0 %vm100_vm0, %v141_v10  ;;  %v262_v20 = vld [vmem:[%s756_s0] sm:$0xf] }
  0x14   :  { %483 = vmatpush.xpose.msk.msra.mxu2 %vm100_vm0, %v136_v11  ;;  %264 = vperm.xlu0 %506, %v262_v20   ;;  %v401_v0 = vld [vmem:[%s762_s6] sm:$0xff] }
  0x15   :  { %486 = vmatpush.xpose.msk.msra.mxu3 %vm100_vm0, %v138_v16 }
  0x16   :  { %479 = vmatpush.xpose.msk.msra.mxu1 %vm100_vm0, %v97_v6 }
  0x17   :  { %489 = vmatpush.xpose.msk.msrb.mxu0 %vm100_vm0, %v140_v17 }
  0x18   :  { %491 = vmatpush.xpose.msk.msrb.mxu2 %vm100_vm0, %v143_v18 }
  0x19   :  { %329 = vmatpush.msrb.mxu3 %v137_v8 }
  0x1a   :  { %480 = vmatpush.xpose.msk.msra.mxu1 %vm100_vm0, %v96_v7 }
  0x1b   :  { %351 = vmatpush.msra.mxu0 %v139_v9  ;;  %330 = vmatpush.msrb.mxu3 %v136_v11  ;;  %v508_v11 = vld [vmem:[%s763_s7] ss:$0 sm:$0xff] }
  0x1c   :  { %492 = vmatpush.xpose.msk.msrb.mxu2 %vm100_vm0, %v142_v19 }
  0x1d   :  { %352 = vmatpush.msra.mxu0 %v138_v16 }
  0x1e   :  { %373 = vmatpush.msrb.mxu1 %v141_v10 }
  0x20   :  { %374 = vmatpush.msrb.mxu1 %v140_v17 }
  0x86   :  { %v265_v32 = vpop.permute.xlu0 %264 }
  0x87   :  { %vm266_vm5 = vcmp.lt.s32.totalorder %v261_v31, %v265_v32 }
  0x8f   :  { %v92_v13 = vpop.f32.mrf.mxu0 }
  0x90   :  { %v93_v14 = vadd.f32 %v507_v12, %v92_v13 }
  0x92   :  { %v95_v15 = vmul.f32 0.17677669, %v93_v14 }
  0x94   :  { %481 = vmatmul.msk.f32.vlgmr.msra.gmra.mxu1 %vm100_vm0, %v95_v15 }
 0x111   :  { %v133_v22 = vpop.f32.mrf.mxu1 }
 0x112   :  { %v146_v23 = vrot.slane %v133_v22, 2  ;;  %484 = vmatmul.msk.f32.vlgmr.msra.gmra.mxu2 %vm100_vm0, %v133_v22  ;;  %v145_v24 = vrot.slane %v133_v22, 1  ;;  %v147_v25 = vrot.slane %v133_v22, 3 }
 0x113   :  { %395 = vmatpush.msra.mxu2 %v143_v18 }
 0x114   :  { %487 = vmatmul.msk.f32.vlgmr.msra.gmra.mxu3 %vm100_vm0, %v145_v24  ;;  %490 = vmatmul.msk.f32.vlgmr.msrb.gmra.mxu0 %vm100_vm0, %v146_v23 }
 0x115   :  { %396 = vmatpush.msra.mxu2 %v142_v19  ;;  %433 = vmatpush.msra.mxu3 %v404_v61 }
 0x117   :  { %434 = vmatpush.msra.mxu3 %v403_v62 }
 0x119   :  { %435 = vmatpush.msra.mxu3 %v402_v63 }
 0x11a   :  { %493 = vmatmul.msk.f32.vlgmr.msrb.gmra.mxu2 %vm100_vm0, %v147_v25 }
 0x11b   :  { %436 = vmatpush.msra.mxu3 %v401_v0 }
 0x191   :  { %v229_v30 = vpop.f32.mrf.mxu0 }
 0x192   :  { %v274_v34 = vrot.slane %v229_v30, 6 }
 0x195   :  { %v173_v26 = vpop.f32.mrf.mxu2 }
 0x197   :  { %v201_v28 = vpop.f32.mrf.mxu3 }
 0x198   :  { %v271_v29 = vrot.slane %v201_v28, 7 }
 0x19a   :  { %v273_v33 = vsel %vm272_vm2, %v271_v29, %v173_v26 }
 0x19b   :  { %v276_v37 = vsel %vm275_vm3, %v274_v34, %v273_v33 }
 0x19d   :  { %v257_v35 = vpop.f32.mrf.mxu2 }
 0x19e   :  { %v277_v36 = vrot.slane %v257_v35, 5 }
 0x1a0   :  { %v279_v38 = vsel %vm278_vm4, %v277_v36, %v276_v37 }
 0x1a1   :  { %v281_v39 = vsel %vm266_vm5, %v279_v38, -1e+30 }
 0x1a2   :  { %v283_v40 = vsel %vm282_vm6, %v281_v39, -inf }
 0x1a3   :  { %284 = vmax.xlane.f32.xlu0 %v283_v40 }
 0x216   :  { %v285_v41 = vpop.xlane.xlu0 %284 }
 0x217   :  { %v286_v42 = vsub.f32 %v281_v39, %v285_v41 }
 0x219   :  { %v287_v43 = vmul.f32 1.442695, %v286_v42 }
 0x21b   :  { %509 = vpow2.f32 %v287_v43 }
 0x221   :  { %v510_v44 = vpop.eup %509 }
 0x222   :  { %v289_v45 = vsel %vm282_vm6, %v510_v44, 0.0 }
 0x223   :  { %290 = vadd.xlane.f32.xlu1 %v289_v45 }
 0x296   :  { %v291_v46 = vpop.xlane.xlu1 %290 }
 0x297   :  { %511 = vrcp.f32 %v291_v46  ;;  %v303_v50 = vand.u32 2147483648, %v291_v46  ;;  %v301_v52 = vand.u32 2147483647, %v291_v46  ;;  %vm297_vm8 = vweird.f32 %v291_v46 }
 0x299   :  { %v304_v54 = vor.u32 1.1754944e-38, %v303_v50  ;;  %vm302_vm10 = vcmp.eq.f32.partialorder %v301_v52, 8.507059e+37 }
 0x29d   :  { %v512_v47 = vpop.eup %511 }
 0x29e   :  { %v293_v48 = vmul.f32 %v512_v47, %v291_v46  ;;  %vm298_vm7 = vweird.f32 %v512_v47 }
 0x29f   :  { %vm299_vm9 = vmor %vm297_vm8, %vm298_vm7 }
 0x2a0   :  { %v294_v49 = vsub.f32 1.0, %v293_v48 }
 0x2a2   :  { %v295_v51 = vmul.f32 %v512_v47, %v294_v49 }
 0x2a4   :  { %v296_v53 = vadd.f32 %v512_v47, %v295_v51 }
 0x2a6   :  { %v300_v55 = vsel %vm299_vm9, %v512_v47, %v296_v53 }
 0x2a7   :  { %v305_v56 = vsel %vm302_vm10, %v304_v54, %v300_v55 }
 0x2a8   :  { %v306_v57 = vmul.f32 %v510_v44, %v305_v56 }
 0x2aa   :  { %307 = vst.msk [vmem:[#allocation8] sm:$0xf] %vm282_vm6, %v306_v57  ;;  %494 = vmatmul.msk.f32.vlgmr.msrb.gmra.mxu3 %vm312_vm11, %v306_v57  ;;  %v309_v58 = vrot.slane %v306_v57, 1  ;;  %v310_v59 = vrot.slane %v306_v57, 2  ;;  %v311_v60 = vrot.slane %v306_v57, 3 }
 0x2ab   :  { %463 = dma.vmem_to_hbm [thread:$0]  %s459_s1, 64, %s461_s22, [#allocation9]  }
 0x2ac   :  { %495 = vmatmul.msk.f32.vlgmr.msra.gmra.mxu0 %vm312_vm11, %v309_v58  ;;  %496 = vmatmul.msk.f32.vlgmr.msrb.gmra.mxu1 %vm312_vm11, %v310_v59 }
 0x2ad   :  { %497 = vmatmul.msk.f32.vlgmr.msra.gmra.mxu2 %vm312_vm11, %v311_v60 }
 0x329   :  { %v354_v1 = vpop.f32.mrf.mxu0  ;;  %v376_v3 = vpop.f32.mrf.mxu1 }
 0x32a   :  { %v413_v2 = vrot.slane %v354_v1, 7  ;;  %v415_v6 = vrot.slane %v376_v3, 6 }
 0x32d   :  { %v332_v4 = vpop.f32.mrf.mxu3 }
 0x32e   :  { %v414_v5 = vsel %vm272_vm2, %v413_v2, %v332_v4 }
 0x32f   :  { %v416_v9 = vsel %vm275_vm3, %v415_v6, %v414_v5 }
 0x330   :  { %v398_v7 = vpop.f32.mrf.mxu2 }
 0x331   :  { %v417_v8 = vrot.slane %v398_v7, 5 }
 0x333   :  { %v418_v10 = vsel %vm278_vm4, %v417_v8, %v416_v9 }
 0x334   :  { %498 = vmatmul.msk.f32.vlgmr.msra.gmra.mxu3 %vm100_vm0, %v418_v10 }
 0x3b7   :  { %v438_v12 = vpop.f32.mrf.mxu3 }
 0x3b8   :  { %v439_v13 = vadd.f32 %v508_v11, %v438_v12 }
 0x3ba   :  { %441 = vst.msk [vmem:[#allocation7] sm:$0xf] %vm282_vm6, %v439_v13 }
 0x3bb   :  { %452 = dma.vmem_to_hbm [thread:$0]  %s448_s25, 64, %s450_s28, [#allocation4]  }
 0x3bc   :  { %613 = dma.done.wait [#allocation4], 64  }
 0x3bd   :  { %614 = vsyncadd [#allocation4], 4294967232 }
 0x3be   :  { %615 = dma.done.wait [#allocation9], 64  }
 0x3bf   :  { %616 = vsyncadd [#allocation9], 4294967232 }
 0x3c0   :  { %472 = vsyncpa [#allocation3], 1 }
 0x3c1   :  { %473 = vsyncpa [#allocation6], 1 }
 0x3c2   :  { %474 = vsyncpa [#allocation4], 1 }
 0x3c3   :  { %475 = vsyncpa [#allocation9], 1 }

</bundles_post_ra>
